<compile_context>
chip_gen: v7x
topology: tpu7x:2x2x1
jax: 0.10.0
libtpu: 0.0.40
codegen_flags: <defaults>
</compile_context>

<pallas_src>
import math
from functools import partial

import jax
import jax.numpy as jnp
from jax.experimental import pallas as pl
from jax.experimental.pallas import tpu as pltpu


# --------------------------------------------------------------------------
# Tiling / VMEM helpers
# --------------------------------------------------------------------------
def _round_up(x, m):
    return ((x + m - 1) // m) * m


def _pad_tile(n, pref):
    """Pick a row tile (multiple of 8, <= pref) and the padded extent it divides.

    Small extents become a single full block (block == padded full dim, which
    satisfies the (8,128) rule); large extents are padded up to a multiple of
    `pref` instead of falling back to one giant block.
    """
    n8 = _round_up(n, 8)
    if n8 <= pref:
        return n8, n8
    return pref, _round_up(n, pref)


def _vmem_limit_bytes():
    """Raise the scoped VMEM limit to ~75% of physical (v5e/v6e: ~96 MiB,
    v7x: ~48 MiB); conservative fallback if the query is unavailable."""
    try:
        cap = int(pltpu.get_tpu_info().vmem_capacity_bytes)
    except Exception:
        cap = 64 * 1024 * 1024
    return max(32 * 1024 * 1024, (cap * 3) // 4)


# --------------------------------------------------------------------------
# Kernel A: fused aa_transform -> K / V projection (bf16 outputs).
#   x2d: (M, aa_dim) f32; weights pre-transposed to (in, out) bf16;
#   outputs K, V (M, latent) bf16.
# --------------------------------------------------------------------------
def _kv_proj_kernel(x_ref, aawt_ref, aab_ref, wkt_ref, wvt_ref, k_ref, v_ref):
    x = x_ref[...].astype(jnp.bfloat16)                       # cast in-kernel (no extra HBM pass)
    xt = (
        jnp.dot(x, aawt_ref[...], preferred_element_type=jnp.float32)
        + aab_ref[...]
    )
    xt = xt.astype(jnp.bfloat16)                               # bf16 MXU operands, f32 accumulation
    k_ref[...] = jnp.dot(
        xt, wkt_ref[...], preferred_element_type=jnp.float32
    ).astype(k_ref.dtype)
    v_ref[...] = jnp.dot(
        xt, wvt_ref[...], preferred_element_type=jnp.float32
    ).astype(v_ref.dtype)


def fused_kv_projection(x2d, aa_wt, aa_b, wk_t, wv_t):
    M, aa_dim = x2d.shape
    latent = aa_wt.shape[1]
    tm, m_pad = _pad_tile(M, pref=512)          # 512-row tiles (~85% of HBM roofline on v6e)
    if m_pad != M:
        x2d = jnp.pad(x2d, ((0, m_pad - M), (0, 0)))

    k, v = pl.pallas_call(
        _kv_proj_kernel,
        grid=(m_pad // tm,),
        in_specs=[
            pl.BlockSpec((tm, aa_dim), lambda i: (i, 0)),
            pl.BlockSpec((aa_dim, latent), lambda i: (0, 0)),
            pl.BlockSpec((1, latent), lambda i: (0, 0)),
            pl.BlockSpec((latent, latent), lambda i: (0, 0)),
            pl.BlockSpec((latent, latent), lambda i: (0, 0)),
        ],
        out_specs=(
            pl.BlockSpec((tm, latent), lambda i: (i, 0)),
            pl.BlockSpec((tm, latent), lambda i: (i, 0)),
        ),
        out_shape=(
            jax.ShapeDtypeStruct((m_pad, latent), jnp.bfloat16),
            jax.ShapeDtypeStruct((m_pad, latent), jnp.bfloat16),
        ),
        compiler_params=pltpu.CompilerParams(
            dimension_semantics=("parallel",),
            vmem_limit_bytes=_vmem_limit_bytes(),
        ),
    )(x2d, aa_wt, aa_b, wk_t, wv_t)

    if m_pad != M:
        k = k[:M]
        v = v[:M]
    return k, v


# --------------------------------------------------------------------------
# Kernel C: fused label-wise multi-head attention + MLP head.
#   grid = (B, C_tiles); b outer so K/V blocks stay resident across label tiles.
# --------------------------------------------------------------------------
def _attn_mlp_kernel(
    lens_ref, q_ref, k_ref, v_ref, w1t_ref, b1_ref, w2_ref, b2_ref,
    logits_ref, *rest, num_heads, output_attentions,
):
    if output_attentions:
        wts_ref, attn_sc = rest
    else:
        (attn_sc,) = rest

    b = pl.program_id(0)
    vlen = lens_ref[b]

    q = q_ref[...]            # (tc, latent) bf16, GO queries with 1/sqrt(dh) folded in
    k = k_ref[0]              # (L, latent)  bf16
    v = v_ref[0]              # (L, latent)  bf16
    tc, latent = q.shape
    L = k.shape[0]
    dh = latent // num_heads

    pos = jax.lax.broadcasted_iota(jnp.int32, (tc, L), 1)
    key_mask = pos < vlen

    for head in range(num_heads):
        csl = slice(head * dh, (head + 1) * dh)

        s = jax.lax.dot_general(
            q[:, csl], k[:, csl], (((1,), (1,)), ((), ())),
            preferred_element_type=jnp.float32,
        )                                                     # (tc, L) f32 scores
        s = jnp.where(key_mask, s, -1000000.0)                # sequence_mask value
        m = jnp.max(s, axis=-1, keepdims=True)
        e = jnp.exp(s - m)
        # approx reciprocal (EUP slot): rows sum to 1 only to ~1e-3
        inv = pl.reciprocal(jnp.sum(e, axis=-1, keepdims=True), approx=True)
        p = e * inv                                           # (tc, L) f32

        if output_attentions:
            # reference transpose_output layout (.., h*L + l); these are VMEM
            # stores into the output block — the HBM writeback is one block
            # DMA per grid step (and bf16 halves its bytes).
            wts_ref[0, :, head * L:(head + 1) * L] = p.astype(wts_ref.dtype)

        out_h = jnp.dot(
            p.astype(jnp.bfloat16), v[:, csl],
            preferred_element_type=jnp.float32,
        )                                                     # (tc, dh)
        attn_sc[:, csl] = out_h                               # assemble label-attn embedding

    # One full-latent-contraction fc1 matmul (instead of H small dh-contractions).
    label_attn = attn_sc[...].astype(jnp.bfloat16)            # (tc, latent)
    h1 = jnp.maximum(
        jnp.dot(label_attn, w1t_ref[...], preferred_element_type=jnp.float32)
        + b1_ref[...],
        0.0,
    )                                                         # (tc, hidden)
    logits = jax.lax.dot_general(
        w2_ref[...], h1.astype(jnp.bfloat16), (((1,), (1,)), ((), ())),
        preferred_element_type=jnp.float32,
    ) + b2_ref[...]                                           # (1, tc), lane-dense
    logits_ref[0] = logits.astype(logits_ref.dtype)


def attention_mlp(q_proj, k_blv, v_blv, lengths, num_heads,
                  fc1_wt, fc1_b, cls_w, cls_b, output_attentions=True):
    C, latent = q_proj.shape
    B, L, _ = k_blv.shape
    hidden = fc1_wt.shape[1]

    tc, c_pad = _pad_tile(C, pref=128)          # tc<=128 keeps v7x's 64 MiB VMEM budget safe
    if c_pad != C:
        q_proj = jnp.pad(q_proj, ((0, c_pad - C), (0, 0)))
    nct = c_pad // tc

    in_specs = [
        pl.BlockSpec((tc, latent), lambda b, c, lens: (c, 0)),
        pl.BlockSpec((1, L, latent), lambda b, c, lens: (b, 0, 0)),
        pl.BlockSpec((1, L, latent), lambda b, c, lens: (b, 0, 0)),
        pl.BlockSpec((latent, hidden), lambda b, c, lens: (0, 0)),
        pl.BlockSpec((1, hidden), lambda b, c, lens: (0, 0)),
        pl.BlockSpec((1, hidden), lambda b, c, lens: (0, 0)),
        pl.BlockSpec((1, 1), lambda b, c, lens: (0, 0)),
    ]
    out_specs = (pl.BlockSpec((1, 1, tc), lambda b, c, lens: (b, 0, c)),)
    out_shape = (jax.ShapeDtypeStruct((B, 1, c_pad), jnp.float32),)
    if output_attentions:
        out_specs = out_specs + (
            pl.BlockSpec((1, tc, num_heads * L), lambda b, c, lens: (b, c, 0)),)
        out_shape = out_shape + (
            jax.ShapeDtypeStruct((B, c_pad, num_heads * L), jnp.bfloat16),)

    grid_spec = pltpu.PrefetchScalarGridSpec(
        num_scalar_prefetch=1,
        grid=(B, nct),
        in_specs=in_specs,
        out_specs=out_specs,
        scratch_shapes=[pltpu.VMEM((tc, latent), jnp.float32)],
    )
    results = pl.pallas_call(
        partial(_attn_mlp_kernel, num_heads=num_heads,
                output_attentions=output_attentions),
        grid_spec=grid_spec,
        out_shape=out_shape,
        compiler_params=pltpu.CompilerParams(
            dimension_semantics=("parallel", "parallel"),
            vmem_limit_bytes=_vmem_limit_bytes(),
        ),
    )(lengths, q_proj, k_blv, v_blv, fc1_wt, fc1_b, cls_w, cls_b)

    logits3 = results[0]
    logits = logits3.reshape(B, c_pad)
    weights = results[1] if output_attentions else None
    if c_pad != C:
        logits = logits[:, :C]
        if weights is not None:
            weights = weights[:, :C, :]
    return logits, weights


# --------------------------------------------------------------------------
# Parameters: torch-convention init + one-time host-side prep
# (transpose, BN fold, GO-query projection + scale fold, bf16 casts)
# --------------------------------------------------------------------------
def init_params(key, aa_dim, latent_dim, nb_classes):
    ks = jax.random.split(key, 8)

    def lin(k, out_dim, in_dim, bias=True):
        bound = 1.0 / math.sqrt(in_dim)
        kw, kb = jax.random.split(k)
        w = jax.random.uniform(kw, (out_dim, in_dim), jnp.float32, -bound, bound)
        b = (jax.random.uniform(kb, (out_dim,), jnp.float32, -bound, bound)
             if bias else jnp.zeros((out_dim,), jnp.float32))
        return w, b

    p = {}
    p["aa_w"], p["aa_b"] = lin(ks[0], latent_dim, aa_dim)
    p["go_emb"] = jax.random.normal(ks[1], (nb_classes, latent_dim), jnp.float32)
    p["wq"], _ = lin(ks[2], latent_dim, latent_dim, bias=False)
    p["wk"], _ = lin(ks[3], latent_dim, latent_dim, bias=False)
    p["wv"], _ = lin(ks[4], latent_dim, latent_dim, bias=False)
    # W_o exists in the torch module but is never used in its forward -> omitted.
    p["fc1_w"], p["fc1_b"] = lin(ks[5], 2 * latent_dim, latent_dim)
    p["cls_w"], p["cls_b"] = lin(ks[6], 1, 2 * latent_dim)
    return p


def prepare_params(params, n_head):
    """One-time host-side prep: transpose weights to (in, out), fold the
    eval-mode BatchNorm1d scale into fc1, precompute the (input-independent)
    GO-query projection with the 1/sqrt(d_head) scale folded in, and cast all
    matmul operands to bf16."""
    # TODO(synk): plumb real BatchNorm running stats / affine params from a
    # trained checkpoint; fresh-module defaults (mean=0, var=1, gamma=1, beta=0)
    # are folded here.
    latent = params["aa_w"].shape[0]
    dh = latent // n_head
    bn_scale = 1.0 / math.sqrt(1.0 + 1e-5)
    q_scaled = (params["go_emb"] @ params["wq"].T) / math.sqrt(dh)
    return {
        "aa_wt": params["aa_w"].T.astype(jnp.bfloat16),        # (aa_dim, latent)
        "aa_b": params["aa_b"].reshape(1, -1).astype(jnp.float32),
        "wk_t": params["wk"].T.astype(jnp.bfloat16),
        "wv_t": params["wv"].T.astype(jnp.bfloat16),
        "q_scaled": q_scaled.astype(jnp.bfloat16),             # (C, latent)
        "fc1_wt": (params["fc1_w"] * bn_scale).T.astype(jnp.bfloat16),  # (latent, hidden)
        "fc1_b": (params["fc1_b"] * bn_scale).reshape(1, -1).astype(jnp.float32),
        "cls_w": params["cls_w"].astype(jnp.bfloat16),         # (1, hidden)
        "cls_b": params["cls_b"].reshape(1, 1).astype(jnp.float32),
    }


# --------------------------------------------------------------------------
# Full forward (post-ESM): logits (B, C) f32, attention weights (B, C, H*L) bf16
# --------------------------------------------------------------------------
def label_wise_attention_forward(prep, x_repr, lengths, n_head,
                                 output_attentions=True):
    # TODO(synk): the ESM-1b backbone (self._model) has no Pallas equivalent;
    # x_repr stands in for model_outputs['representations'][33].
    # TODO(synk): BCEWithLogitsLoss branch (labels is not None) is out of kernel
    # scope; this returns logits (and optional attention weights) only.
    x = x_repr[:, 1:]                                        # drop BOS -> (B, L, aa_dim)
    B, L, aa_dim = x.shape
    latent = prep["aa_wt"].shape[1]

    # fused aa_transform -> K / V projection (xt never written to HBM; K/V in bf16)
    k2d, v2d = fused_kv_projection(
        x.reshape(B * L, aa_dim), prep["aa_wt"], prep["aa_b"],
        prep["wk_t"], prep["wv_t"])
    k = k2d.reshape(B, L, latent)
    v = v2d.reshape(B, L, latent)

    # GO-label query projection is precomputed in prepare_params (no per-forward kernel).
    return attention_mlp(
        prep["q_scaled"], k, v, lengths.astype(jnp.int32), n_head,
        prep["fc1_wt"], prep["fc1_b"], prep["cls_w"], prep["cls_b"],
        output_attentions=output_attentions)


# --------------------------------------------------------------------------
# Pure-JAX reference (for correctness checking only)
# --------------------------------------------------------------------------
def _reference_forward(params, x_repr, lengths, n_head):
    x = x_repr[:, 1:]
    B, L, _ = x.shape
    latent = params["aa_w"].shape[0]
    H = n_head
    dh = latent // H
    C = params["go_emb"].shape[0]

    xt = x @ params["aa_w"].T + params["aa_b"]
    k = xt @ params["wk"].T
    v = xt @ params["wv"].T
    q = params["go_emb"] @ params["wq"].T

    qh = q.reshape(C, H, dh).transpose(1, 0, 2)
    kh = k.reshape(B, L, H, dh).transpose(0, 2, 1, 3)
    vh = v.reshape(B, L, H, dh).transpose(0, 2, 1, 3)
    scores = jnp.einsum("hcd,bhld->bhcl", qh, kh) / math.sqrt(dh)
    mask = jnp.arange(L)[None, None, None, :] < lengths[:, None, None, None]
    scores = jnp.where(mask, scores, -1000000.0)
    p = jax.nn.softmax(scores, axis=-1)
    out = jnp.einsum("bhcl,bhld->bhcd", p, vh)
    label_attn = out.transpose(0, 2, 1, 3).reshape(B, C, latent)
    weights = p.transpose(0, 2, 1, 3).reshape(B, C, H * L)

    s = 1.0 / math.sqrt(1.0 + 1e-5)
    h1 = jnp.maximum((label_attn @ params["fc1_w"].T + params["fc1_b"]) * s, 0.0)
    logits = h1 @ params["cls_w"].T + params["cls_b"]
    return logits[..., 0], weights


if __name__ == "__main__":
    # Small, forward-consistent shapes.
    B, L_with_bos, aa_dim = 2, 17, 32        # ESM-style representation incl. BOS
    latent_dim, n_head, nb_classes = 32, 4, 16

    key = jax.random.PRNGKey(0)
    k_param, k_x = jax.random.split(key)
    params = init_params(k_param, aa_dim, latent_dim, nb_classes)
    prep = prepare_params(params, n_head)

    x_repr = jax.random.normal(k_x, (B, L_with_bos, aa_dim), jnp.float32)
    lengths = jnp.array([12, 7], dtype=jnp.int32)

    logits, weights = label_wise_attention_forward(
        prep, x_repr, lengths, n_head, output_attentions=True)
    logits = jax.block_until_ready(logits)
    weights = jax.block_until_ready(weights)

    assert logits.shape == (B, nb_classes)
    assert weights.shape == (B, nb_classes, n_head * (L_with_bos - 1))
    assert bool(jnp.all(jnp.isfinite(logits))) and bool(jnp.all(jnp.isfinite(weights)))

    ref_logits, ref_weights = _reference_forward(params, x_repr, lengths, n_head)
    assert bool(jnp.allclose(logits, ref_logits, rtol=3e-2, atol=3e-2)), \
        float(jnp.max(jnp.abs(logits - ref_logits)))
    assert bool(jnp.allclose(weights.astype(jnp.float32), ref_weights,
                             rtol=3e-2, atol=2e-2)), \
        float(jnp.max(jnp.abs(weights.astype(jnp.float32) - ref_weights)))

    # logits-only path: attention-weights output (largest HBM term) skipped entirely.
    logits_only, no_w = label_wise_attention_forward(
        prep, x_repr, lengths, n_head, output_attentions=False)
    logits_only = jax.block_until_ready(logits_only)
    assert no_w is None
    assert bool(jnp.allclose(logits_only, logits, rtol=1e-5, atol=1e-5))

    print("KERNEL_OK")
</pallas_src>

<mosaic_0001>
module attributes {stable_mosaic.version = 11 : i64} {
  func.func @_kv_proj_kernel(%arg0: i32, %arg1: memref<32x32xf32, #tpu.memory_space<vmem>>, %arg2: memref<32x32xbf16, #tpu.memory_space<vmem>>, %arg3: memref<1x32xf32, #tpu.memory_space<vmem>>, %arg4: memref<32x32xbf16, #tpu.memory_space<vmem>>, %arg5: memref<32x32xbf16, #tpu.memory_space<vmem>>, %arg6: memref<32x32xbf16, #tpu.memory_space<vmem>>, %arg7: memref<32x32xbf16, #tpu.memory_space<vmem>>) attributes {dimension_semantics = [#tpu.dimension_semantics<parallel>], iteration_bounds = array<i64: 1>, scalar_prefetch = 0 : i64, scratch_operands = 0 : i64, tpu.core_type = #tpu.core_type<tc>, window_params = [{transform_indices = @transform_0, window_bounds = array<i64: 32, 32>}, {pipeline_mode = #tpu.pipeline_mode<synchronous>, transform_indices = @transform_1, window_bounds = array<i64: 32, 32>}, {pipeline_mode = #tpu.pipeline_mode<synchronous>, transform_indices = @transform_2, window_bounds = array<i64: 1, 32>}, {pipeline_mode = #tpu.pipeline_mode<synchronous>, transform_indices = @transform_3, window_bounds = array<i64: 32, 32>}, {pipeline_mode = #tpu.pipeline_mode<synchronous>, transform_indices = @transform_4, window_bounds = array<i64: 32, 32>}, {transform_indices = @transform_5, window_bounds = array<i64: 32, 32>}, {transform_indices = @transform_6, window_bounds = array<i64: 32, 32>}]} {
    %c0 = arith.constant 0 : index
    %c0_0 = arith.constant 0 : index
    %0 = vector.load %arg1[%c0, %c0_0] : memref<32x32xf32, #tpu.memory_space<vmem>>, vector<32x32xf32>
    %1 = arith.truncf %0 : vector<32x32xf32> to vector<32x32xbf16>
    %c0_1 = arith.constant 0 : index
    %c0_2 = arith.constant 0 : index
    %2 = vector.load %arg2[%c0_1, %c0_2] : memref<32x32xbf16, #tpu.memory_space<vmem>>, vector<32x32xbf16>
    %cst = arith.constant dense<0.000000e+00> : vector<32x32xf32>
    %3 = tpu.matmul %1, %2, %cst {dimension_numbers = #tpu.dot_dimension_numbers<[1], [0], [0], [1], [0, 0, 1, 1], [], []>} : vector<32x32xbf16>, vector<32x32xbf16>, vector<32x32xf32> -> vector<32x32xf32>
    %c0_3 = arith.constant 0 : index
    %c0_4 = arith.constant 0 : index
    %4 = vector.load %arg3[%c0_3, %c0_4] : memref<1x32xf32, #tpu.memory_space<vmem>>, vector<1x32xf32>
    %5 = vector.broadcast %4 : vector<1x32xf32> to vector<32x32xf32>
    %6 = arith.addf %3, %5 : vector<32x32xf32>
    %7 = arith.truncf %6 : vector<32x32xf32> to vector<32x32xbf16>
    %c0_5 = arith.constant 0 : index
    %c0_6 = arith.constant 0 : index
    %8 = vector.load %arg4[%c0_5, %c0_6] : memref<32x32xbf16, #tpu.memory_space<vmem>>, vector<32x32xbf16>
    %cst_7 = arith.constant dense<0.000000e+00> : vector<32x32xf32>
    %9 = tpu.matmul %7, %8, %cst_7 {dimension_numbers = #tpu.dot_dimension_numbers<[1], [0], [0], [1], [0, 0, 1, 1], [], []>} : vector<32x32xbf16>, vector<32x32xbf16>, vector<32x32xf32> -> vector<32x32xf32>
    %10 = arith.truncf %9 : vector<32x32xf32> to vector<32x32xbf16>
    %c0_8 = arith.constant 0 : index
    %c0_9 = arith.constant 0 : index
    %11 = vector.load %arg6[%c0_8, %c0_9] : memref<32x32xbf16, #tpu.memory_space<vmem>>, vector<32x32xbf16>
    tpu.vector_store %arg6[%c0_8, %c0_9], %10 {strides = array<i32>} : memref<32x32xbf16, #tpu.memory_space<vmem>>, vector<32x32xbf16>,
    %c0_10 = arith.constant 0 : index
    %c0_11 = arith.constant 0 : index
    %12 = vector.load %arg5[%c0_10, %c0_11] : memref<32x32xbf16, #tpu.memory_space<vmem>>, vector<32x32xbf16>
    %cst_12 = arith.constant dense<0.000000e+00> : vector<32x32xf32>
    %13 = tpu.matmul %7, %12, %cst_12 {dimension_numbers = #tpu.dot_dimension_numbers<[1], [0], [0], [1], [0, 0, 1, 1], [], []>} : vector<32x32xbf16>, vector<32x32xbf16>, vector<32x32xf32> -> vector<32x32xf32>
    %14 = arith.truncf %13 : vector<32x32xf32> to vector<32x32xbf16>
    %c0_13 = arith.constant 0 : index
    %c0_14 = arith.constant 0 : index
    %15 = vector.load %arg7[%c0_13, %c0_14] : memref<32x32xbf16, #tpu.memory_space<vmem>>, vector<32x32xbf16>
    tpu.vector_store %arg7[%c0_13, %c0_14], %14 {strides = array<i32>} : memref<32x32xbf16, #tpu.memory_space<vmem>>, vector<32x32xbf16>,
    return
  }
  func.func @transform_0(%arg0: i32) -> (i32, i32) {
    %c0_i32 = arith.constant 0 : i32
    %c0_i32_0 = arith.constant 0 : i32
    return %arg0, %c0_i32 : i32, i32
  }
  func.func @transform_1(%arg0: i32) -> (i32, i32) {
    %c0_i32 = arith.constant 0 : i32
    %c0_i32_0 = arith.constant 0 : i32
    %c0_i32_1 = arith.constant 0 : i32
    return %c0_i32, %c0_i32_0 : i32, i32
  }
  func.func @transform_2(%arg0: i32) -> (i32, i32) {
    %c0_i32 = arith.constant 0 : i32
    %c0_i32_0 = arith.constant 0 : i32
    %c0_i32_1 = arith.constant 0 : i32
    return %c0_i32, %c0_i32_0 : i32, i32
  }
  func.func @transform_3(%arg0: i32) -> (i32, i32) {
    %c0_i32 = arith.constant 0 : i32
    %c0_i32_0 = arith.constant 0 : i32
    %c0_i32_1 = arith.constant 0 : i32
    return %c0_i32, %c0_i32_0 : i32, i32
  }
  func.func @transform_4(%arg0: i32) -> (i32, i32) {
    %c0_i32 = arith.constant 0 : i32
    %c0_i32_0 = arith.constant 0 : i32
    %c0_i32_1 = arith.constant 0 : i32
    return %c0_i32, %c0_i32_0 : i32, i32
  }
  func.func @transform_5(%arg0: i32) -> (i32, i32) {
    %c0_i32 = arith.constant 0 : i32
    %c0_i32_0 = arith.constant 0 : i32
    return %arg0, %c0_i32 : i32, i32
  }
  func.func @transform_6(%arg0: i32) -> (i32, i32) {
    %c0_i32 = arith.constant 0 : i32
    %c0_i32_0 = arith.constant 0 : i32
    return %arg0, %c0_i32 : i32, i32
  }
}

</mosaic_0001>

<bundles_post_ra>
// kernel: tpu_custom_call.1
= control target key start
LH: loop header
LB: loop body
LE: loop exit
PB: predicated region body
PF: predicated region fallthrough
CT: control target
= control target key end

     0   :  { %12 = vsyncpa [#allocation3], 0  ;;  %s765_s0 = inlined_call_operand.hbm [shape: f32[32,32], index: 0, kind: input, shape index: {}]   ;;  %s766_s1 = inlined_call_operand.hbm [shape: bf16[32,32], index: 1, kind: input, shape index: {}]   ;;  %s767_s2 = inlined_call_operand.vmem [shape: f32[1,32], index: 2, kind: input, shape index: {}]   ;;  %s768_s3 = inlined_call_operand.hbm [shape: bf16[32,32], index: 3, kind: input, shape index: {}]   ;;  %s769_s4 = inlined_call_operand.hbm [shape: bf16[32,32], index: 4, kind: input, shape index: {}]   ;;  %s770_s5 = inlined_call_operand.hbm [shape: bf16[32,32], index: 5, kind: output, shape index: {0}]   ;;  %s771_s6 = inlined_call_operand.hbm [shape: bf16[32,32], index: 6, kind: output, shape index: {1}]  }
   0x1   :  { %13 = vsyncpa [#allocation6], 0 }
   0x2   :  { %14 = vsyncpa [#allocation9], 0 }
   0x3   :  { %15 = vsyncpa [#allocation4], 0 }
   0x4   :  { %16 = vsyncpa [#allocation12], 0  ;;  %s602_s21 = smov [#allocation5]   ;;  %s460_s25 = scalar_lea.hbm %s766_s1, 256 }
   0x5   :  { %s34_s22 = sshll.u32 %s602_s21, 4  ;;  %p461_p0 = scmp.ne.s32.totalorder %s766_s1, %s460_s25  ;;  %s35_s22 = int_to_ptr.vmem [resolvable:$true] %s34_s22 }
   0x6   :  { %p464_p1 = scmp.lt.u32.totalorder %s460_s25, %s766_s1 }
   0x8   :  { %p466_p2 = pnand %p464_p1, %p461_p0 }
   0xa   :  { %469 = shalt.err (!%p466_p2)
}
   0xb   :  { %s470_s30 = scalar_lea.vmem %s35_s22, 256  ;;  %p475_p4 = scmp.lt.s32.totalorder %s35_s22, %s35_s22 }
   0xc   :  { %p471_p3 = scmp.ne.s32.totalorder %s35_s22, %s470_s30  ;;  %p476_p5 = scmp.lt.s32.totalorder %s470_s30, %s470_s30 }
   0xe   :  { %p477_p6 = por %p476_p5, %p475_p4 }
  0x10   :  { %p478_p7 = pnand %p477_p6, %p471_p3 }
  0x12   :  { %481 = shalt.err (!%p478_p7)
}
  0x13   :  { %s603_s7 = smov 64   ;;  %s604_s8 = smov 4  }
  0x14   :  { %40 = dma.hbm_to_vmem [thread:$0]  %s766_s1, 256, %s35_s22, [#allocation6], %s603_s7, %s603_s7, %s604_s8  }
  0x15   :  { %s605_s11 = smov [#allocation2]   ;;  %s482_s15 = scalar_lea.hbm %s765_s0, 512 }
  0x16   :  { %s22_s12 = sshll.u32 %s605_s11, 4  ;;  %p483_p8 = scmp.ne.s32.totalorder %s765_s0, %s482_s15  ;;  %s23_s12 = int_to_ptr.vmem [resolvable:$true] %s22_s12 }
  0x17   :  { %p486_p9 = scmp.lt.u32.totalorder %s482_s15, %s765_s0 }
  0x19   :  { %p488_p10 = pnand %p486_p9, %p483_p8 }
  0x1b   :  { %491 = shalt.err (!%p488_p10)
}
  0x1c   :  { %s492_s20 = scalar_lea.vmem %s23_s12, 512  ;;  %p497_p12 = scmp.lt.s32.totalorder %s23_s12, %s23_s12 }
  0x1d   :  { %p493_p11 = scmp.ne.s32.totalorder %s23_s12, %s492_s20  ;;  %p498_p13 = scmp.lt.s32.totalorder %s492_s20, %s492_s20 }
  0x1f   :  { %p499_p0 = por %p498_p13, %p497_p12 }
  0x21   :  { %p500_p1 = pnand %p499_p0, %p493_p11 }
  0x23   :  { %503 = shalt.err (!%p500_p1)
}
  0x24   :  { %s606_s1 = smov 128   ;;  %s607_s21 = smov 8  }
  0x25   :  { %28 = dma.hbm_to_vmem [thread:$0]  %s765_s0, 512, %s23_s12, [#allocation3], %s606_s1, %s606_s1, %s607_s21  }
  0x26   :  { %s608_s24 = smov [#allocation7]   ;;  %s609_s26 = smov [#allocation8]  }
  0x27   :  { %s48_s25 = sshll.u32 %s608_s24, 4  ;;  %s60_s27 = sshll.u32 %s609_s26, 4  ;;  %s49_s25 = int_to_ptr.vmem [resolvable:$true] %s48_s25  ;;  %s674_s27 = int_to_ptr.vmem [resolvable:$true] %s60_s27 }
  0x28   :  { %s504_s30 = scalar_lea.hbm %s768_s3, 256 }
  0x29   :  { %p505_p2 = scmp.ne.s32.totalorder %s768_s3, %s504_s30  ;;  %p508_p3 = scmp.lt.u32.totalorder %s504_s30, %s768_s3 }
  0x2b   :  { %p510_p4 = pnand %p508_p3, %p505_p2 }
  0x2d   :  { %513 = shalt.err (!%p510_p4)
}
  0x2e   :  { %s514_s0 = scalar_lea.vmem %s49_s25, 256  ;;  %p519_p6 = scmp.lt.s32.totalorder %s49_s25, %s49_s25 }
  0x2f   :  { %p515_p5 = scmp.ne.s32.totalorder %s49_s25, %s514_s0  ;;  %p520_p7 = scmp.lt.s32.totalorder %s514_s0, %s514_s0 }
  0x31   :  { %p521_p8 = por %p520_p7, %p519_p6 }
  0x33   :  { %p522_p9 = pnand %p521_p8, %p515_p5 }
  0x35   :  { %525 = shalt.err (!%p522_p9)
}
  0x36   :  { %54 = dma.hbm_to_vmem [thread:$0]  %s768_s3, 256, %s49_s25, [#allocation6], %s603_s7, %s603_s7, %s604_s8  }
  0x37   :  { %s526_s17 = scalar_lea.hbm %s769_s4, 256 }
  0x38   :  { %p527_p10 = scmp.ne.s32.totalorder %s769_s4, %s526_s17  ;;  %p530_p11 = scmp.lt.u32.totalorder %s526_s17, %s769_s4 }
  0x3a   :  { %p532_p12 = pnand %p530_p11, %p527_p10 }
  0x3c   :  { %535 = shalt.err (!%p532_p12)
}
  0x3d   :  { %s536_s21 = scalar_lea.vmem %s674_s27, 256  ;;  %p541_p0 = scmp.lt.s32.totalorder %s674_s27, %s674_s27 }
  0x3e   :  { %p537_p13 = scmp.ne.s32.totalorder %s674_s27, %s536_s21  ;;  %p542_p1 = scmp.lt.s32.totalorder %s536_s21, %s536_s21 }
  0x40   :  { %p543_p2 = por %p542_p1, %p541_p0 }
  0x42   :  { %p544_p3 = pnand %p543_p2, %p537_p13 }
  0x44   :  { %547 = shalt.err (!%p544_p3)
}
  0x45   :  { %66 = dma.hbm_to_vmem [thread:$0]  %s769_s4, 256, %s674_s27, [#allocation9], %s603_s7, %s603_s7, %s604_s8  }
  0x46   :  { %592 = dma.done.wait [#allocation3], 512  }
  0x47   :  { %593 = vsyncadd [#allocation3], 4294966784 }
  0x48   :  { %594 = dma.done.wait [#allocation6], 512  }
  0x49   :  { %595 = vsyncadd [#allocation6], 4294966784 }
  0x4a   :  { %596 = dma.done.wait [#allocation9], 256  }
  0x4b   :  { %597 = vsyncadd [#allocation9], 4294967040  ;;  %v454_v0 = vld [vmem:[#allocation5] sm:$0xff]   ;;  %v455_v1 = vld [vmem:[#allocation5 + $0x8] sm:$0xff]   ;;  %vm109_vm0 = vcmask 261120   ;;  %vm254_vm1 = vcmask 257024  }
  0x4c   :  { %420 = vmatprep.subr.bf16.mxu0 %v454_v0  ;;  %v80_v2 = vld [vmem:[#allocation2] sm:$0xff]  ;;  %v81_v3 = vld [vmem:[#allocation2 + $0x8] sm:$0xff]  ;;  %v82_v4 = vld [vmem:[#allocation2 + $0x10] sm:$0xff]  ;;  %s611_s25 = smov [#allocation11]  }
  0x4d   :  { %421 = vmatpush3.bf16.msra.mxu0 %v454_v0  ;;  %v84_v5 = vpack.c.bf16 %v81_v3, %v80_v2  ;;  %v83_v6 = vld [vmem:[#allocation2 + $0x18] sm:$0xff]  ;;  %v456_v8 = vld [vmem:[#allocation8] sm:$0xff]   ;;  %v457_v9 = vld [vmem:[#allocation7] sm:$0xff]   ;;  %s361_s26 = sshll.u32 %s611_s25, 4  ;;  %s726_s26 = int_to_ptr.vmem [resolvable:$true] %s361_s26 }
  0x4e   :  { %422 = vmatprep.subr.bf16.mxu0 %v455_v1  ;;  %v85_v7 = vpack.c.bf16 %v83_v6, %v82_v4  ;;  %428 = vmatprep.subr.bf16.mxu1 %v457_v9  ;;  %v458_v10 = vld [vmem:[#allocation8 + $0x8] sm:$0xff]   ;;  %v459_v11 = vld [vmem:[#allocation7 + $0x8] sm:$0xff]   ;;  %v379_v13 = vld [vmem:[%s767_s2] ss:$0 sm:$0xff]  ;;  %s610_s2 = smov [#allocation10]  }
  0x4f   :  { %424 = vmatprep.mubr.msk.bf16.mxu0 %vm109_vm0, %v84_v5  ;;  %429 = vmatpush3.bf16.msra.mxu1 %v457_v9  ;;  %s349_s24 = sshll.u32 %s610_s2, 4  ;;  %s350_s24 = int_to_ptr.vmem [resolvable:$true] %s349_s24 }
  0x50   :  { %430 = vmatprep.subr.bf16.mxu1 %v459_v11  ;;  %s548_s27 = scalar_lea.vmem %s350_s24, 256  ;;  %p553_p5 = scmp.lt.s32.totalorder %s350_s24, %s350_s24 }
  0x51   :  { %423 = vmatpush3.bf16.msra.mxu0 %v455_v1  ;;  %p549_p4 = scmp.ne.s32.totalorder %s350_s24, %s548_s27  ;;  %p554_p6 = scmp.lt.s32.totalorder %s548_s27, %s548_s27 }
  0x52   :  { %436 = vmatprep.subr.bf16.mxu0 %v456_v8 }
  0x53   :  { %431 = vmatpush3.bf16.msra.mxu1 %v459_v11  ;;  %p555_p7 = por %p554_p6, %p553_p5 }
  0x54   :  { %425 = vmatmul.mubr.msk.bf16.vlgmr.msra.gmra.mrb[0].mxu0 %vm109_vm0, %v85_v7 }
  0x55   :  { %437 = vmatpush3.bf16.msra.mxu0 %v456_v8  ;;  %p556_p8 = pnand %p555_p7, %p549_p4 }
  0x56   :  { %438 = vmatprep.subr.bf16.mxu0 %v458_v10 }
  0x59   :  { %439 = vmatpush3.bf16.msra.mxu0 %v458_v10 }
 0x127   :  { %v426_v12 = vpop.f32.mrb[0].mxu0 }
 0x128   :  { %v150_v14 = vpop.f32.mrb[1].mxu0  ;;  %v159_v16 = vadd.f32 %v426_v12, %v379_v13 }
 0x129   :  { %v427_v15 = vpop.f32.mrb[2].mxu0  ;;  %v151_v19 = vadd.f32 %v379_v13, %v150_v14 }
 0x12a   :  { %v162_v17 = vadd.f32 %v427_v15, %v379_v13  ;;  %v153_v18 = vpop.f32.mrb[3].mxu0 }
 0x12b   :  { %v154_v20 = vadd.f32 %v379_v13, %v153_v18 }
 0x12c   :  { %v166_v21 = vpack.c.bf16 %v162_v17, %v159_v16 }
 0x12d   :  { %v165_v22 = vpack.c.bf16 %v154_v20, %v151_v19 }
 0x12f   :  { %432 = vmatprep.mubr.msk.bf16.mxu1 %vm109_vm0, %v165_v22  ;;  %440 = vmatprep.mubr.msk.bf16.mxu0 %vm109_vm0, %v165_v22 }
 0x130   :  { %433 = vmatmul.mubr.msk.bf16.vlgmr.msra.gmra.mrb[0].mxu1 %vm109_vm0, %v166_v21  ;;  %441 = vmatmul.mubr.msk.bf16.vlgmr.msra.gmra.mrb[4].mxu0 %vm109_vm0, %v166_v21 }
 0x203   :  { %v434_v23 = vpop.f32.mrb[0].mxu1  ;;  %v442_v24 = vpop.f32.mrb[4].mxu0 }
 0x204   :  { %v402_v25 = vpack.c.bf16 %v434_v23, %v434_v23  ;;  %v406_v26 = vpack.c.bf16 %v442_v24, %v442_v24  ;;  %v223_v27 = vpop.f32.mrb[1].mxu1  ;;  %v309_v28 = vpop.f32.mrb[5].mxu0 }
 0x205   :  { %v400_v29 = vpack.c.bf16 %v223_v27, %v223_v27  ;;  %v404_v30 = vpack.c.bf16 %v309_v28, %v309_v28  ;;  %v435_v31 = vpop.f32.mrb[2].mxu1  ;;  %v443_v32 = vpop.f32.mrb[6].mxu0 }
 0x206   :  { %257 = vst.msk [vmem:[#allocation10 + $0x8] sm:$0xf] %vm254_vm1, %v402_v25  ;;  %342 = vst.msk [vmem:[#allocation11 + $0x8] sm:$0xf] %vm254_vm1, %v406_v26  ;;  %v403_v33 = vpack.c.bf16 %v435_v31, %v435_v31  ;;  %v407_v34 = vpack.c.bf16 %v443_v32, %v443_v32  ;;  %v226_v35 = vpop.f32.mrb[3].mxu1  ;;  %v312_v36 = vpop.f32.mrb[7].mxu0 }
 0x207   :  { %255 = vst.msk [vmem:[#allocation10] sm:$0xf] %vm254_vm1, %v400_v29  ;;  %340 = vst.msk [vmem:[#allocation11] sm:$0xf] %vm254_vm1, %v404_v30  ;;  %v401_v37 = vpack.c.bf16 %v226_v35, %v226_v35  ;;  %v405_v38 = vpack.c.bf16 %v312_v36, %v312_v36 }
 0x208   :  { %258 = vst.msk [vmem:[#allocation10 + $0xc] sm:$0xf] %vm254_vm1, %v403_v33  ;;  %343 = vst.msk [vmem:[#allocation11 + $0xc] sm:$0xf] %vm254_vm1, %v407_v34 }
 0x209   :  { %256 = vst.msk [vmem:[#allocation10 + $0x4] sm:$0xf] %vm254_vm1, %v401_v37  ;;  %341 = vst.msk [vmem:[#allocation11 + $0x4] sm:$0xf] %vm254_vm1, %v405_v38 }
 0x20a   :  { %559 = shalt.err (!%p556_p8)
}
 0x20b   :  { %s560_s30 = scalar_lea.hbm %s770_s5, 256 }
 0x20c   :  { %p561_p9 = scmp.ne.s32.totalorder %s770_s5, %s560_s30  ;;  %p564_p10 = scmp.lt.u32.totalorder %s560_s30, %s770_s5 }
 0x20e   :  { %p566_p11 = pnand %p564_p10, %p561_p9 }
 0x210   :  { %569 = shalt.err (!%p566_p11)
}
 0x211   :  { %355 = dma.vmem_to_hbm [thread:$0]  %s350_s24, 256, %s770_s5, [#allocation4], %s603_s7, %s603_s7, %s604_s8  }
 0x212   :  { %s570_s14 = scalar_lea.vmem %s726_s26, 256  ;;  %p575_p13 = scmp.lt.s32.totalorder %s726_s26, %s726_s26 }
 0x213   :  { %p571_p12 = scmp.ne.s32.totalorder %s726_s26, %s570_s14  ;;  %p576_p0 = scmp.lt.s32.totalorder %s570_s14, %s570_s14 }
 0x215   :  { %p577_p1 = por %p576_p0, %p575_p13 }
 0x217   :  { %p578_p2 = pnand %p577_p1, %p571_p12 }
 0x219   :  { %581 = shalt.err (!%p578_p2)
}
 0x21a   :  { %s582_s17 = scalar_lea.hbm %s771_s6, 256 }
 0x21b   :  { %p583_p3 = scmp.ne.s32.totalorder %s771_s6, %s582_s17  ;;  %p586_p4 = scmp.lt.u32.totalorder %s582_s17, %s771_s6 }
 0x21d   :  { %p588_p5 = pnand %p586_p4, %p583_p3 }
 0x21f   :  { %591 = shalt.err (!%p588_p5)
}
 0x220   :  { %367 = dma.vmem_to_hbm [thread:$0]  %s726_s26, 256, %s771_s6, [#allocation12], %s603_s7, %s603_s7, %s604_s8  }
 0x221   :  { %598 = dma.done.wait [#allocation4], 256  }
 0x222   :  { %599 = vsyncadd [#allocation4], 4294967040 }
 0x223   :  { %600 = dma.done.wait [#allocation12], 256  }
 0x224   :  { %601 = vsyncadd [#allocation12], 4294967040 }
 0x225   :  { %374 = vsyncpa [#allocation3], 1 }
 0x226   :  { %375 = vsyncpa [#allocation6], 1 }
 0x227   :  { %376 = vsyncpa [#allocation9], 1 }
 0x228   :  { %377 = vsyncpa [#allocation4], 1 }
 0x229   :  { %378 = vsyncpa [#allocation12], 1 }

</bundles_post_ra>
